<compile_context>
chip_gen: v5e
topology: v5e:2x2
jax: 0.10.0
libtpu: 0.0.40
codegen_flags: <defaults>
</compile_context>

<pallas_src>
import jax
import jax.numpy as jnp
from jax.experimental import pallas as pl
from jax.experimental.pallas import tpu as pltpu

EPS = 1e-5


# --------------------------- kernels ---------------------------

def _conv_rows_and_stats(a_f32, t_ref, y_ref, part_ref, pad_ref):
    """3x3 SAME conv of one image's rows (a_f32: (H, W*C) f32) via three
    accumulating bf16 MXU matmuls against row-Toeplitz weight slabs
    t_ref: (3, W*C, W*C), plus lane-dense per-tile BN partial stats."""
    H, WC = a_f32.shape
    # Re-establish the H-halo every step (scratch is per-core; do not rely on
    # persistence across grid steps under "parallel" semantics).
    pad_ref[0:1, :] = jnp.zeros((1, WC), jnp.bfloat16)
    pad_ref[H + 1:H + 2, :] = jnp.zeros((1, WC), jnp.bfloat16)
    # Single f32->bf16 cast, lane-aligned (offset 0) interior store.
    pad_ref[1:H + 1, :] = a_f32.astype(jnp.bfloat16)

    # Three accumulating matmuls (one per kh), bf16 operands, f32 accumulation.
    y = jnp.dot(pad_ref[0:H, :], t_ref[0], preferred_element_type=jnp.float32)
    y = y + jnp.dot(pad_ref[1:H + 1, :], t_ref[1], preferred_element_type=jnp.float32)
    y = y + jnp.dot(pad_ref[2:H + 2, :], t_ref[2], preferred_element_type=jnp.float32)
    y_ref[...] = y

    # Reduce-before-fold: sublane sum / sum-of-squares only (XLU); the
    # per-channel fold happens on the tiny reduced result in the wrapper.
    part_ref[0:1, :] = jnp.sum(y, axis=0, keepdims=True)
    part_ref[1:2, :] = jnp.sum(y * y, axis=0, keepdims=True)


def conv1_kernel(x_ref, t_ref, y_ref, part_ref, pad_ref):
    _conv_rows_and_stats(x_ref[...], t_ref, y_ref, part_ref, pad_ref)


def bn_relu_conv2_kernel(y1_ref, scale_ref, shift_ref, t_ref, y_ref, part_ref,
                         pad_ref):
    a = jnp.maximum(y1_ref[...] * scale_ref[...] + shift_ref[...], 0.0)
    _conv_rows_and_stats(a, t_ref, y_ref, part_ref, pad_ref)


def bn_add_relu_kernel(y2_ref, x_ref, scale_ref, shift_ref, out_ref):
    out_ref[...] = jnp.maximum(
        y2_ref[...] * scale_ref[...] + shift_ref[...] + x_ref[...], 0.0)


# --------------------------- wrapper ---------------------------

def _conv3x3_row_toeplitz(w_hwio, W):
    """(3,3,Cin,Cout) HWIO -> (3, W*Cin, W*Cout) row-Toeplitz slabs T such that
    row_padded[kh] @ T[kh] summed over kh gives the stride-1 / pad-1 3x3 conv of
    a whole image row laid out lane-dense as (w, cout).  W-direction padding is
    implicit: taps that fall outside the row are dropped (they hit zeros)."""
    _, _, Cin, Cout = w_hwio.shape
    wi = jnp.arange(W)[:, None]          # input pixel
    wo = jnp.arange(W)[None, :]          # output pixel
    kw = wi - wo + 1                     # which horizontal tap connects them
    valid = (kw >= 0) & (kw < 3)
    taps = w_hwio[:, jnp.clip(kw, 0, 2), :, :]              # (3, W, W, Cin, Cout)
    taps = jnp.where(valid[None, :, :, None, None], taps, 0.0)
    return jnp.transpose(taps, (0, 1, 3, 2, 4)).reshape(3, W * Cin, W * Cout)


def _bn_scale_shift(part, gamma, beta, count, W, C):
    """part: (N, 2, W*C) per-tile [sum, sumsq] -> lane-dense (1, W*C) scale/shift."""
    s = jnp.sum(part, axis=0).reshape(2, W, C).sum(axis=1)   # (2, C)
    mean = s[0] / count
    var = s[1] / count - mean * mean                          # biased variance
    scale_c = gamma * jax.lax.rsqrt(var + EPS)
    shift_c = beta - mean * scale_c
    # Broadcast per-channel values across the fused (w, c) lane dim (VPU-side tile,
    # not an MXU matmul).
    scale = jnp.tile(scale_c, W).reshape(1, W * C)
    shift = jnp.tile(shift_c, W).reshape(1, W * C)
    return scale, shift


def basic_block_pallas(x_nchw, w1, g1, b1, w2, g2, b2):
    """x_nchw: (N, C, H, W) f32.  w1/w2: (3,3,Cin,Cout) HWIO (Cin == Cout since
    stride=1, downsample=None).  g*/b*: (C,) BatchNorm affine parameters."""
    N, C, H, W = x_nchw.shape
    assert w1.shape[-1] == C, "BasicBlock with stride=1 / no downsample has Cin == Cout"
    WC = W * C
    count = float(N * H * W)

    # Lane-dense activation layout: (N, H, W*C) with c fastest (lane = w*C + c).
    x_rows = jnp.transpose(x_nchw, (0, 2, 3, 1)).reshape(N, H, WC)

    # bf16 MXU weight slabs (f32 accumulation happens in-kernel).
    t1 = _conv3x3_row_toeplitz(w1, W).astype(jnp.bfloat16)    # (3, WC, WC)
    t2 = _conv3x3_row_toeplitz(w2, W).astype(jnp.bfloat16)

    act_spec = pl.BlockSpec((None, H, WC), lambda n: (n, 0, 0))
    part_spec = pl.BlockSpec((None, 2, WC), lambda n: (n, 0, 0))
    t_spec = pl.BlockSpec((3, WC, WC), lambda n: (0, 0, 0))
    vec_spec = pl.BlockSpec((1, WC), lambda n: (0, 0))
    cparams = pltpu.CompilerParams(
        dimension_semantics=("parallel",),          # batch elements are independent
        vmem_limit_bytes=32 * 1024 * 1024)

    pad_scratch = pltpu.VMEM((H + 2, WC), jnp.bfloat16)       # bf16 padded activations

    # ---- pass A: conv1 + BN1 partial stats ----
    y1, part1 = pl.pallas_call(
        conv1_kernel,
        out_shape=(jax.ShapeDtypeStruct((N, H, WC), jnp.float32),
                   jax.ShapeDtypeStruct((N, 2, WC), jnp.float32)),
        grid=(N,),
        in_specs=[act_spec, t_spec],
        out_specs=(act_spec, part_spec),
        scratch_shapes=[pad_scratch],
        compiler_params=cparams,
    )(x_rows, t1)

    scale1, shift1 = _bn_scale_shift(part1, g1, b1, count, W, C)

    # ---- pass B: bn1 + relu + conv2 + BN2 partial stats ----
    y2, part2 = pl.pallas_call(
        bn_relu_conv2_kernel,
        out_shape=(jax.ShapeDtypeStruct((N, H, WC), jnp.float32),
                   jax.ShapeDtypeStruct((N, 2, WC), jnp.float32)),
        grid=(N,),
        in_specs=[act_spec, vec_spec, vec_spec, t_spec],
        out_specs=(act_spec, part_spec),
        scratch_shapes=[pad_scratch],
        compiler_params=cparams,
    )(y1, scale1, shift1, t2)

    scale2, shift2 = _bn_scale_shift(part2, g2, b2, count, W, C)

    # ---- pass C: bn2 + residual add + relu ----
    out = pl.pallas_call(
        bn_add_relu_kernel,
        out_shape=jax.ShapeDtypeStruct((N, H, WC), jnp.float32),
        grid=(N,),
        in_specs=[act_spec, act_spec, vec_spec, vec_spec],
        out_specs=act_spec,
        compiler_params=cparams,
    )(y2, x_rows, scale2, shift2)

    return jnp.transpose(out.reshape(N, H, W, C), (0, 3, 1, 2))   # back to NCHW


# ---------------- pure-JAX f32 reference (sanity check) ----------------
def basic_block_ref(x_nchw, w1, g1, b1, w2, g2, b2):
    x = jnp.transpose(x_nchw, (0, 2, 3, 1))

    def conv(y, w):
        return jax.lax.conv_general_dilated(
            y, w, window_strides=(1, 1), padding='SAME',
            dimension_numbers=('NHWC', 'HWIO', 'NHWC'))

    def bn(y, g, b):
        mean = y.mean(axis=(0, 1, 2), keepdims=True)
        var = ((y - mean) ** 2).mean(axis=(0, 1, 2), keepdims=True)
        return ((y - mean) * jax.lax.rsqrt(var + EPS)
                * g.reshape(1, 1, 1, -1) + b.reshape(1, 1, 1, -1))

    out = jnp.maximum(bn(conv(x, w1), g1, b1), 0.0)
    out = bn(conv(out, w2), g2, b2)
    out = jnp.maximum(out + x, 0.0)
    return jnp.transpose(out, (0, 3, 1, 2))


if __name__ == "__main__":
    # Small shapes consistent with BasicBlock(inplanes=8, planes=8, stride=1);
    # W*C = 128 keeps the fused (w, c) lane dim exactly one vreg wide.
    N, C, H, W = 2, 8, 16, 16

    key = jax.random.PRNGKey(0)
    kx, kw1, kw2, kg1, kb1, kg2, kb2 = jax.random.split(key, 7)

    x = jax.random.normal(kx, (N, C, H, W), jnp.float32)
    # conv3x3 weights, HWIO layout, no bias (matches nn.Conv2d(bias=False)).
    w1 = 0.1 * jax.random.normal(kw1, (3, 3, C, C), jnp.float32)
    w2 = 0.1 * jax.random.normal(kw2, (3, 3, C, C), jnp.float32)
    # BN affine params (torch default is gamma=1, beta=0; perturb slightly).
    g1 = 1.0 + 0.1 * jax.random.normal(kg1, (C,), jnp.float32)
    b1 = 0.1 * jax.random.normal(kb1, (C,), jnp.float32)
    g2 = 1.0 + 0.1 * jax.random.normal(kg2, (C,), jnp.float32)
    b2 = 0.1 * jax.random.normal(kb2, (C,), jnp.float32)

    out = basic_block_pallas(x, w1, g1, b1, w2, g2, b2)
    out = jax.block_until_ready(out)

    ref = jax.block_until_ready(basic_block_ref(x, w1, g1, b1, w2, g2, b2))
    assert out.shape == (N, C, H, W)
    # Tolerance vs the f32 reference is loosened because the conv matmuls use
    # bf16 operands on the MXU (f32 accumulation).
    assert jnp.allclose(out, ref, rtol=3e-2, atol=3e-2), "mismatch vs reference"

    print("KERNEL_OK")
</pallas_src>

<mosaic_0001>
module attributes {stable_mosaic.version = 11 : i64} {
  func.func @conv1_kernel(%arg0: i32, %arg1: memref<1x16x128xf32, #tpu.memory_space<vmem>>, %arg2: memref<3x128x128xbf16, #tpu.memory_space<vmem>>, %arg3: memref<1x16x128xf32, #tpu.memory_space<vmem>>, %arg4: memref<1x2x128xf32, #tpu.memory_space<vmem>>, %arg5: memref<18x128xbf16, #tpu.memory_space<vmem>>) attributes {dimension_semantics = [#tpu.dimension_semantics<parallel>], iteration_bounds = array<i64: 2>, scalar_prefetch = 0 : i64, scratch_operands = 1 : i64, tpu.core_type = #tpu.core_type<tc>, window_params = [{transform_indices = @transform_0, window_bounds = array<i64: 1, 16, 128>}, {pipeline_mode = #tpu.pipeline_mode<synchronous>, transform_indices = @transform_1, window_bounds = array<i64: 3, 128, 128>}, {transform_indices = @transform_2, window_bounds = array<i64: 1, 16, 128>}, {transform_indices = @transform_3, window_bounds = array<i64: 1, 2, 128>}]} {
    %c0 = arith.constant 0 : index
    %c0_0 = arith.constant 0 : index
    %c0_1 = arith.constant 0 : index
    %0 = vector.load %arg1[%c0, %c0_0, %c0_1] : memref<1x16x128xf32, #tpu.memory_space<vmem>>, vector<1x16x128xf32>
    %1 = vector.shape_cast %0 : vector<1x16x128xf32> to vector<16x128xf32>
    %cst = arith.constant 0.000000e+00 : bf16
    %2 = vector.broadcast %cst : bf16 to vector<1x128xbf16>
    %c0_2 = arith.constant 0 : index
    %c0_3 = arith.constant 0 : index
    %3 = vector.load %arg5[%c0_2, %c0_3] : memref<18x128xbf16, #tpu.memory_space<vmem>>, vector<1x128xbf16>
    tpu.vector_store %arg5[%c0_2, %c0_3], %2 {strides = array<i32>} : memref<18x128xbf16, #tpu.memory_space<vmem>>, vector<1x128xbf16>,
    %cst_4 = arith.constant 0.000000e+00 : bf16
    %4 = vector.broadcast %cst_4 : bf16 to vector<1x128xbf16>
    %c17 = arith.constant 17 : index
    %c0_5 = arith.constant 0 : index
    %5 = vector.load %arg5[%c17, %c0_5] : memref<18x128xbf16, #tpu.memory_space<vmem>>, vector<1x128xbf16>
    tpu.vector_store %arg5[%c17, %c0_5], %4 {strides = array<i32>} : memref<18x128xbf16, #tpu.memory_space<vmem>>, vector<1x128xbf16>,
    %6 = arith.truncf %1 : vector<16x128xf32> to vector<16x128xbf16>
    %c1 = arith.constant 1 : index
    %c0_6 = arith.constant 0 : index
    %7 = vector.load %arg5[%c1, %c0_6] : memref<18x128xbf16, #tpu.memory_space<vmem>>, vector<16x128xbf16>
    tpu.vector_store %arg5[%c1, %c0_6], %6 {strides = array<i32>} : memref<18x128xbf16, #tpu.memory_space<vmem>>, vector<16x128xbf16>,
    %c0_7 = arith.constant 0 : index
    %c0_8 = arith.constant 0 : index
    %8 = vector.load %arg5[%c0_7, %c0_8] : memref<18x128xbf16, #tpu.memory_space<vmem>>, vector<16x128xbf16>
    %c0_9 = arith.constant 0 : index
    %c0_10 = arith.constant 0 : index
    %c0_11 = arith.constant 0 : index
    %9 = vector.load %arg2[%c0_9, %c0_10, %c0_11] : memref<3x128x128xbf16, #tpu.memory_space<vmem>>, vector<1x128x128xbf16>
    %10 = vector.shape_cast %9 : vector<1x128x128xbf16> to vector<128x128xbf16>
    %cst_12 = arith.constant dense<0.000000e+00> : vector<16x128xf32>
    %11 = tpu.matmul %8, %10, %cst_12 {dimension_numbers = #tpu.dot_dimension_numbers<[1], [0], [0], [1], [0, 0, 1, 1], [], []>} : vector<16x128xbf16>, vector<128x128xbf16>, vector<16x128xf32> -> vector<16x128xf32>
    %c1_13 = arith.constant 1 : index
    %c0_14 = arith.constant 0 : index
    %12 = vector.load %arg5[%c1_13, %c0_14] : memref<18x128xbf16, #tpu.memory_space<vmem>>, vector<16x128xbf16>
    %c1_15 = arith.constant 1 : index
    %c0_16 = arith.constant 0 : index
    %c0_17 = arith.constant 0 : index
    %13 = vector.load %arg2[%c1_15, %c0_16, %c0_17] : memref<3x128x128xbf16, #tpu.memory_space<vmem>>, vector<1x128x128xbf16>
    %14 = vector.shape_cast %13 : vector<1x128x128xbf16> to vector<128x128xbf16>
    %cst_18 = arith.constant dense<0.000000e+00> : vector<16x128xf32>
    %15 = tpu.matmul %12, %14, %cst_18 {dimension_numbers = #tpu.dot_dimension_numbers<[1], [0], [0], [1], [0, 0, 1, 1], [], []>} : vector<16x128xbf16>, vector<128x128xbf16>, vector<16x128xf32> -> vector<16x128xf32>
    %16 = arith.addf %11, %15 : vector<16x128xf32>
    %c2 = arith.constant 2 : index
    %c0_19 = arith.constant 0 : index
    %17 = vector.load %arg5[%c2, %c0_19] : memref<18x128xbf16, #tpu.memory_space<vmem>>, vector<16x128xbf16>
    %c2_20 = arith.constant 2 : index
    %c0_21 = arith.constant 0 : index
    %c0_22 = arith.constant 0 : index
    %18 = vector.load %arg2[%c2_20, %c0_21, %c0_22] : memref<3x128x128xbf16, #tpu.memory_space<vmem>>, vector<1x128x128xbf16>
    %19 = vector.shape_cast %18 : vector<1x128x128xbf16> to vector<128x128xbf16>
    %cst_23 = arith.constant dense<0.000000e+00> : vector<16x128xf32>
    %20 = tpu.matmul %17, %19, %cst_23 {dimension_numbers = #tpu.dot_dimension_numbers<[1], [0], [0], [1], [0, 0, 1, 1], [], []>} : vector<16x128xbf16>, vector<128x128xbf16>, vector<16x128xf32> -> vector<16x128xf32>
    %21 = arith.addf %16, %20 : vector<16x128xf32>
    %c0_24 = arith.constant 0 : index
    %c0_25 = arith.constant 0 : index
    %c0_26 = arith.constant 0 : index
    %22 = vector.load %arg3[%c0_24, %c0_25, %c0_26] : memref<1x16x128xf32, #tpu.memory_space<vmem>>, vector<1x16x128xf32>
    %23 = vector.shape_cast %22 : vector<1x16x128xf32> to vector<16x128xf32>
    %24 = vector.shape_cast %21 : vector<16x128xf32> to vector<1x16x128xf32>
    tpu.vector_store %arg3[%c0_24, %c0_25, %c0_26], %24 {strides = array<i32>} : memref<1x16x128xf32, #tpu.memory_space<vmem>>, vector<1x16x128xf32>,
    %cst_27 = arith.constant dense<0.000000e+00> : vector<128xf32>
    %25 = vector.multi_reduction <add>, %21, %cst_27 [0] : vector<16x128xf32> to vector<128xf32>
    %26 = vector.shape_cast %25 : vector<128xf32> to vector<1x128xf32>
    %c0_28 = arith.constant 0 : index
    %c0_29 = arith.constant 0 : index
    %c0_30 = arith.constant 0 : index
    %27 = vector.load %arg4[%c0_28, %c0_29, %c0_30] : memref<1x2x128xf32, #tpu.memory_space<vmem>>, vector<1x1x128xf32>
    %28 = vector.shape_cast %27 : vector<1x1x128xf32> to vector<1x128xf32>
    %29 = vector.shape_cast %26 : vector<1x128xf32> to vector<1x1x128xf32>
    tpu.vector_store %arg4[%c0_28, %c0_29, %c0_30], %29 {strides = array<i32>} : memref<1x2x128xf32, #tpu.memory_space<vmem>>, vector<1x1x128xf32>,
    %30 = arith.mulf %21, %21 : vector<16x128xf32>
    %cst_31 = arith.constant dense<0.000000e+00> : vector<128xf32>
    %31 = vector.multi_reduction <add>, %30, %cst_31 [0] : vector<16x128xf32> to vector<128xf32>
    %32 = vector.shape_cast %31 : vector<128xf32> to vector<1x128xf32>
    %c0_32 = arith.constant 0 : index
    %c1_33 = arith.constant 1 : index
    %c0_34 = arith.constant 0 : index
    %33 = vector.load %arg4[%c0_32, %c1_33, %c0_34] : memref<1x2x128xf32, #tpu.memory_space<vmem>>, vector<1x1x128xf32>
    %34 = vector.shape_cast %33 : vector<1x1x128xf32> to vector<1x128xf32>
    %35 = vector.shape_cast %32 : vector<1x128xf32> to vector<1x1x128xf32>
    tpu.vector_store %arg4[%c0_32, %c1_33, %c0_34], %35 {strides = array<i32>} : memref<1x2x128xf32, #tpu.memory_space<vmem>>, vector<1x1x128xf32>,
    return
  }
  func.func @transform_0(%arg0: i32) -> (i32, i32, i32) {
    %c0_i32 = arith.constant 0 : i32
    %c0_i32_0 = arith.constant 0 : i32
    %c0_i32_1 = arith.constant 0 : i32
    return %arg0, %c0_i32, %c0_i32_0 : i32, i32, i32
  }
  func.func @transform_1(%arg0: i32) -> (i32, i32, i32) {
    %c0_i32 = arith.constant 0 : i32
    %c0_i32_0 = arith.constant 0 : i32
    %c0_i32_1 = arith.constant 0 : i32
    %c0_i32_2 = arith.constant 0 : i32
    return %c0_i32, %c0_i32_0, %c0_i32_1 : i32, i32, i32
  }
  func.func @transform_2(%arg0: i32) -> (i32, i32, i32) {
    %c0_i32 = arith.constant 0 : i32
    %c0_i32_0 = arith.constant 0 : i32
    %c0_i32_1 = arith.constant 0 : i32
    return %arg0, %c0_i32, %c0_i32_0 : i32, i32, i32
  }
  func.func @transform_3(%arg0: i32) -> (i32, i32, i32) {
    %c0_i32 = arith.constant 0 : i32
    %c0_i32_0 = arith.constant 0 : i32
    %c0_i32_1 = arith.constant 0 : i32
    return %arg0, %c0_i32, %c0_i32_0 : i32, i32, i32
  }
}

</mosaic_0001>

<bundles_post_ra>
// kernel: tpu_custom_call.1
= control target key start
LH: loop header
LB: loop body
LE: loop exit
PB: predicated region body
PF: predicated region fallthrough
CT: control target
= control target key end

     0   :  { %9 = vsyncpa [#allocation4], 0  ;;  %s1296_s0 = inlined_call_operand.hbm [shape: f32[2,16,128], index: 0, kind: input, shape index: {}]   ;;  %s1297_s1 = inlined_call_operand.hbm [shape: bf16[3,128,128], index: 1, kind: input, shape index: {}]   ;;  %s1298_s2 = inlined_call_operand.hbm [shape: f32[2,16,128], index: 2, kind: output, shape index: {0}]   ;;  %s1299_s3 = inlined_call_operand.hbm [shape: f32[2,2,128], index: 3, kind: output, shape index: {1}]  }
   0x1   :  { %11 = vsyncpa [#allocation4 + $0x1], 0 }
   0x2   :  { %12 = vsyncpa [#allocation7], 0 }
   0x3   :  { %13 = vsyncpa [#allocation5], 0 }
   0x4   :  { %15 = vsyncpa [#allocation5 + $0x1], 0 }
   0x5   :  { %16 = vsyncpa [#allocation10], 0 }
   0x6   :  { %18 = vsyncpa [#allocation10 + $0x1], 0  ;;  %s1117_s12 = smov 0   ;;  %s1119_s13 = smov 0  }
   0x7   :  { %s1121_s14 = smov 0   ;;  %s1123_s15 = smov 0  }
   0x8 LB: > { %s1138_s16 = sadd.s32 4294967295, %s1088_s15   ;;  %s710_s17 = sadd.s32 4294967294, %s1088_s15   ;;  %s1088_s15 = sphi %s1123_s15, %s1313_s15   ;;  %s1084_s14 = sphi %s1121_s14, %s1312_s14   ;;  %s1080_s13 = sphi %s1119_s13, %s1311_s13   ;;  %s1076_s12 = sphi %s1117_s12, %s1310_s12  }
   0x9   : > { %p44_p0 = scmp.ne.s32.totalorder %s1080_s13, %s1076_s12  ;;  %p45_p1 = scmp.eq.s32.totalorder %s1138_s16, 0 }
   0xa   : > { %p89_p2 = scmp.eq.s32.totalorder %s1138_s16, 1  ;;  %p95_p3 = scmp.eq.s32.totalorder %s710_s17, 1 }
   0xb   : > { %p1147_p4 = por %p45_p1, %p44_p0  ;;  %p711_p5 = scmp.ge.s32.totalorder %s1088_s15, 1 }
   0xc   : > { %p1152_p6 = por %p95_p3, %p44_p0  ;;  %p128_p7 = scmp.lt.s32.totalorder %s1088_s15, 3 }
   0xd   : > { %s139_s22 = sshll.u32 %s1297_s1, 4  ;;  %s1090_s24 = smov [#allocation6]   ;;  %s140_s22 = int_to_ptr.hbm [resolvable:$true] %s139_s22 }
   0xe   : > { %p1160_p8 = pnand %p711_p5, %p128_p7  ;;  %s141_s25 = sshll.u32 %s1090_s24, 4  ;;  %s142_s25 = int_to_ptr.vmem [resolvable:$true] %s141_s25 }
   0xf   : > { %s1170_s26 = sadd.s32 1, %s1088_s15   ;;  %s1091_s27 = smov 64  }
  0x10   : > { %p868_p9 = pneg %p1160_p8  ;;  %s1092_s28 = smov 4  }
  0x11   : > { %s28_s29 = ssub.s32 %s1088_s15, %s1170_s26  ;;  %s31_s30 = sadd.s32 1, %s1084_s14 }
  0x12   : > { %p869_p10 = pnand %p868_p9, %p45_p1  ;;  %p29_p12 = scmp.eq.s32.totalorder %s28_s29, 0 }
  0x13   : > { %p38_p13 = scmp.ne.s32.totalorder %s1084_s14, %s1080_s13  ;;  %p39_p0 = scmp.eq.s32.totalorder %s1088_s15, 0 }
  0x14   : > { %871 = dma.hbm_to_vmem [thread:$0]  (!%p869_p10), %s140_s22, 3072, %s142_s25, [#allocation7], %s1091_s27, %s1091_s27, %s1092_s28  }
  0x15   : > { %p884_p3 = scmp.lt.s32.totalorder %s1088_s15, 2  ;;  %p40_p5 = por %p39_p0, %p38_p13 }
  0x16   : > { %s1180_s4 = scalar_select %p29_p12, %s1084_s14, %s31_s30  }
  0x17   : > { %p1184_p7 = por %p89_p2, %p38_p13  ;;  %s155_s6 = sand.u32 1, %s1084_s14  }
  0x18   : > { %s825_s7 = sshll.u32 %s1088_s15, 4  ;;  %s714_s8 = sshll.u32 %s155_s6, 4 }
  0x19   : > { %s164_s11 = scalar_lea.hbm %s1296_s0, %s825_s7  ;;  %s159_s20 = scalar_lea.vmem [#allocation3], %s714_s8 }
  0x1a   : > { %s165_s17 = sshll.u32 %s164_s11, 4  ;;  %s167_s21 = sshll.u32 %s159_s20, 4  ;;  %s166_s17 = int_to_ptr.hbm [resolvable:$true] %s165_s17  ;;  %s168_s21 = int_to_ptr.vmem [resolvable:$true] %s167_s21 }
  0x1b   : > { %p1195_p9 = pnand %p884_p3, %p40_p5  ;;  %s156_s24 = scalar_lea.sflag [#allocation4], %s155_s6 }
  0x1c   : > { %s956_s25 = sshra.s32 %s166_s17, 4  ;;  %s963_s30 = scalar_lea.hbm %s1296_s0, 32  ;;  %s957_s25 = int_to_ptr.hbm [resolvable:$true] %s956_s25 }
  0x1d   : > { %s958_s27 = scalar_lea.hbm %s957_s25, 16  ;;  %p960_p10 = pneg %p1195_p9 }
  0x1e   : > { %p959_p2 = scmp.ne.s32.totalorder %s957_s25, %s958_s27  ;;  %p964_p0 = scmp.lt.s32.totalorder %s957_s25, %s1296_s0 }
  0x1f   : > { %p965_p3 = scmp.lt.s32.totalorder %s963_s30, %s958_s27 }
  0x20   : > { %p961_p12 = pnand %p960_p10, %p959_p2 }
  0x21   : > { %p966_p5 = por %p965_p3, %p964_p0 }
  0x22   : > { %p962_p13 = pneg %p961_p12 }
  0x24   : > { %p967_p11 = pnand %p966_p5, %p962_p13 }
  0x26   : > { %970 = shalt.err (!%p967_p11)
}
  0x27   : > { %s1093_s6 = smov 128   ;;  %s1094_s9 = smov 8  }
  0x28   : > { %875 = dma.hbm_to_vmem [thread:$0]  (!%p1195_p9), %s166_s17, 256, %s168_s21, %s156_s24, %s1093_s6, %s1093_s6, %s1094_s9  }
  0x29   : > { %179 = sbr.rel (%p1160_p8) target bundleno = 244 (0xf4), region = 28  ;;  %s1212_s10 = sand.u32 (!%p1160_p8), 1, %s1080_s13  }
  0x2a   : > { %s718_s11 = sshll.u32 (!%p1160_p8), %s1212_s10, 4  ;;  %s182_s20 = scalar_lea.sflag (!%p1160_p8), [#allocation4], %s1212_s10 }
  0x2b   : > { %s185_s25 = scalar_lea.vmem (!%p1160_p8), [#allocation3], %s718_s11 }
  0x2e   : > { %1059 = dma.done.wait (%p1147_p4), %s182_s20, 256  }
  0x2f   : > { %1061 = vsyncadd (%p1147_p4), %s182_s20, 4294967040 }
  0x30   : > { %1063 = dma.done.wait (%p45_p1), [#allocation7], 3072  }
  0x31   : > { %1065 = vsyncadd (%p45_p1), [#allocation7], 4294964224  ;;  %v841_v0 = vld [vmem:[#allocation6 + $0x78] sm:$0xff]  ;;  %v840_v3 = vld [vmem:[#allocation6 + $0x70] sm:$0xff]  ;;  %vm223_vm0 = vsmask.f32 256 }
  0x32   : > { %v833_v1 = vld [vmem:[#allocation6 + $0x38] sm:$0xff]  ;;  %372 = vmatpush.bf16.msra.mxu0 %v841_v0  ;;  %v832_v4 = vld [vmem:[#allocation6 + $0x30] sm:$0xff]  ;;  %vm222_vm1 = vcmask 1040384   ;;  %vm228_vm2 = vsmask.f32 7938  ;;  %v839_v6 = vld [vmem:[#allocation6 + $0x68] sm:$0xff] }
  0x33   : > { %v849_v2 = vld [vmem:[#allocation6 + $0xb8] sm:$0xff]  ;;  %435 = vmatpush.bf16.msra.mxu1 %v833_v1  ;;  %v848_v5 = vld [vmem:[#allocation6 + $0xb0] sm:$0xff]  ;;  %v831_v7 = vld [vmem:[#allocation6 + $0x28] sm:$0xff]  ;;  %vm235_vm5 = vsmask.f32 4368  ;;  %vm257_vm6 = vcmask 1043456  }
  0x34   : > { %523 = vmatpush.bf16.msra.mxu2 %v849_v2  ;;  %vm1227_vm3 = vmand %vm222_vm1, %vm223_vm0  ;;  %v847_v9 = vld [vmem:[#allocation6 + $0xa8] sm:$0xff]  ;;  %v220_v11 = vld [vmem:[%s185_s25] sm:$0xff]  ;;  %vm470_vm9 = vcmask 1046528   ;;  %vm310_vm10 = vsmask.f32 7424  ;;  %s850_s18 = sshll.u32 %s1138_s16, 4 }
  0x35   : > { %vm1232_vm4 = vmand %vm222_vm1, %vm228_vm2  ;;  %v221_v12 = vld [vmem:[%s185_s25 + $0x8] sm:$0xff]  ;;  %v225_v13 = vld [vmem:[#allocation2] sm:$0x1]  ;;  %v233_v16 = vpack.c.bf16 %v220_v11, %v220_v11  ;;  %s211_s23 = scalar_lea.vmem [#allocation8], %s718_s11  ;;  %s576_s22 = scalar_lea.hbm %s1298_s2, %s850_s18 }
  0x36   : > { %373 = vmatpush.bf16.msra.mxu0 %v840_v3  ;;  %v226_v14 = vsel %vm1227_vm3, 0, %v225_v13  ;;  %v230_v15 = vld [vmem:[#allocation2 + $0x8] sm:$0x1]  ;;  %v234_v17 = vpack.c.bf16 %v221_v12, %v221_v12  ;;  %v838_v18 = vld [vmem:[#allocation6 + $0x60] sm:$0xff]  ;;  %vm236_vm7 = vmor %vm223_vm0, %vm235_vm5  ;;  %s577_s24 = sshll.u32 %s211_s23, 4  ;;  %s579_s27 = sshll.u32 %s576_s22, 4  ;;  %s578_s24 = int_to_ptr.vmem [resolvable:$true] %s577_s24  ;;  %s580_s27 = int_to_ptr.hbm [resolvable:$true] %s579_s27 }
  0x37   : > { %436 = vmatpush.bf16.msra.mxu1 %v832_v4  ;;  %v830_v19 = vld [vmem:[#allocation6 + $0x20] sm:$0xff]  ;;  %227 = vst [vmem:[#allocation2] sm:$0x1] %v226_v14  ;;  %v231_v21 = vsel %vm1232_vm4, 0, %v230_v15  ;;  %v238_v22 = vshrl.u32 %v233_v16, 16  ;;  %v241_v23 = vshll.u32 %v233_v16, 16  ;;  %vm258_vm8 = vmand %vm257_vm6, %vm228_vm2 }
  0x38   : > { %524 = vmatpush.bf16.msra.mxu2 %v848_v5  ;;  %v846_v20 = vld [vmem:[#allocation6 + $0xa0] sm:$0xff]  ;;  %232 = vst [vmem:[#allocation2 + $0x8] sm:$0x1] %v231_v21  ;;  %v246_v24 = vshrl.u32 %v234_v17, 16  ;;  %v249_v25 = vshll.u32 %v234_v17, 16  ;;  %v837_v28 = vld [vmem:[#allocation6 + $0x58] sm:$0xff] }
  0x39   : > { %v240_v26 = vrot.slane %v238_v22, 7  ;;  %v829_v29 = vld [vmem:[#allocation6 + $0x18] sm:$0xff]  ;;  %v836_v37 = vld [vmem:[#allocation6 + $0x50] sm:$0xff]  ;;  %v835_v43 = vld [vmem:[#allocation6 + $0x48] sm:$0xff]  ;;  %s560_s28 = scalar_lea.sflag [#allocation5], %s1212_s10  ;;  %s1000_s29 = sshra.s32 %s580_s27, 4  ;;  %s1001_s29 = int_to_ptr.hbm [resolvable:$true] %s1000_s29 }
  0x3a   : > { %374 = vmatpush.bf16.msra.mxu0 %v839_v6  ;;  %v248_v27 = vrot.slane %v246_v24, 7  ;;  %v845_v30 = vld [vmem:[#allocation6 + $0x98] sm:$0xff]  ;;  %v828_v38 = vld [vmem:[#allocation6 + $0x10] sm:$0xff]  ;;  %v827_v44 = vld [vmem:[#allocation6 + $0x8] sm:$0xff]  ;;  %s1002_s30 = scalar_lea.hbm %s1001_s29, 16  ;;  %s1006_s6 = scalar_lea.hbm %s1298_s2, 32 }
  0x3b   : > { %437 = vmatpush.bf16.msra.mxu1 %v831_v7  ;;  %v243_v31 = vor.u32 %v241_v23, %v240_v26  ;;  %v244_v32 = vrot.slane %v240_v26, 4  ;;  %v844_v41 = vld [vmem:[#allocation6 + $0x90] sm:$0xff]  ;;  %v843_v45 = vld [vmem:[#allocation6 + $0x88] sm:$0xff]  ;;  %v834_v46 = vld [vmem:[#allocation6 + $0x40] sm:$0xff]  ;;  %p1003_p1 = scmp.ne.s32.totalorder %s1001_s29, %s1002_s30  ;;  %p1007_p11 = scmp.lt.s32.totalorder %s1001_s29, %s1298_s2 }
  0x3c   : > { %525 = vmatpush.bf16.msra.mxu2 %v847_v9  ;;  %v251_v33 = vor.u32 %v249_v25, %v248_v27  ;;  %v253_v34 = vrot.slane %v248_v27, 4  ;;  %v826_v48 = vld [vmem:[#allocation6] sm:$0xff]  ;;  %p1008_p9 = scmp.lt.s32.totalorder %s1006_s6, %s1002_s30 }
  0x3d   : > { %v842_v51 = vld [vmem:[#allocation6 + $0x80] sm:$0xff]  ;;  %p1004_p4 = pnand %p1003_p1, %p1184_p7 }
  0x3e   : > { %375 = vmatpush.bf16.msra.mxu0 %v838_v18  ;;  %v252_v35 = vsel %vm236_vm7, %v244_v32, %v251_v33  ;;  %v259_v36 = vld [vmem:[#allocation2] sm:$0xf]  ;;  %p1009_p2 = por %p1008_p9, %p1007_p11 }
  0x3f   : > { %438 = vmatpush.bf16.msra.mxu1 %v830_v19  ;;  %v260_v39 = vsel %vm258_vm8, %v243_v31, %v259_v36  ;;  %262 = vst [vmem:[#allocation2 + $0x4] sm:$0xf] %v252_v35  ;;  %v263_v40 = vld [vmem:[#allocation2 + $0x8] sm:$0x1]  ;;  %p1005_p8 = pneg %p1004_p4 }
  0x40   : > { %526 = vmatpush.bf16.msra.mxu2 %v846_v20  ;;  %261 = vst [vmem:[#allocation2] sm:$0xf] %v260_v39  ;;  %v264_v42 = vsel %vm1227_vm3, %v253_v34, %v263_v40 }
  0x41   : > { %265 = vst [vmem:[#allocation2 + $0x8] sm:$0x1] %v264_v42  ;;  %p1010_p10 = pnand %p1009_p2, %p1005_p8 }
  0x42   : > { %376 = vmatpush.bf16.msra.mxu0 %v837_v28 }
  0x43   : > { %439 = vmatpush.bf16.msra.mxu1 %v829_v29 }
  0x44   : > { %527 = vmatpush.bf16.msra.mxu2 %v845_v30 }
  0x46   : > { %377 = vmatpush.bf16.msra.mxu0 %v836_v37  ;;  %v855_v47 = vld [vmem:[#allocation2] sm:$0xf0] }
  0x47   : > { %440 = vmatpush.bf16.msra.mxu1 %v828_v38  ;;  %v852_v49 = vld [vmem:[#allocation2] sm:$0xff]  }
  0x48   : > { %528 = vmatpush.bf16.msra.mxu2 %v844_v41  ;;  %v856_v50 = vld [vmem:[#allocation2] sm:$0xe]  ;;  %v284_v52 = vld [vmem:[#allocation2 + $0x8] sm:$0x1]  ;;  %v314_v53 = vshll.u32 %v852_v49, 16  ;;  %v312_v56 = vshrl.u32 %v852_v49, 16 }
  0x49   : > { %v857_v54 = vor.u32 %v856_v50, %v855_v47  ;;  %v307_v55 = vunpack.c.l.b16 %v284_v52 }
  0x4a   : > { %378 = vmatpush.bf16.msra.mxu0 %v835_v43  ;;  %v316_v57 = vrot.slane %v314_v53, 1 }
  0x4b   : > { %441 = vmatpush.bf16.msra.mxu1 %v827_v44  ;;  %v309_v58 = vpack.c.b16 %v307_v55, %v307_v55  ;;  %v471_v59 = vrot.slane %v857_v54, 1 }
  0x4c   : > { %529 = vmatpush.bf16.msra.mxu2 %v843_v45  ;;  %v317_v60 = vor.u32 %v316_v57, %v312_v56 }
  0x4d   : > { %v319_v61 = vshll.u32 %v309_v58, 16  ;;  %v472_v62 = vrot.slane %v309_v58, 1 }
  0x4e   : > { %379 = vmatpush.bf16.msra.mxu0 %v834_v46 }
  0x4f   : > { %442 = vmatpush.bf16.msra.mxu1 %v826_v48  ;;  %v321_v63 = vrot.slane %v319_v61, 1  ;;  %v473_v0 = vsel %vm470_vm9, %v471_v59, %v472_v62 }
  0x50   : > { %530 = vmatpush.bf16.msra.mxu2 %v842_v51 }
  0x51   : > { %v322_v1 = vsel %vm310_vm10, %v317_v60, %v321_v63 }
  0x52   : > { %443 = vmatmul.bf16.vlgmr.msra.gmra.mxu1 %v852_v49  ;;  %380 = vmatmul.bf16.vlgmr.msra.gmra.mxu0 %v322_v1 }
  0x53   : > { %531 = vmatmul.bf16.vlgmr.msra.gmra.mxu2 %v473_v0 }
  0xcf   : > { %v444_v2 = vpop.f32.mrf.mxu1  ;;  %v381_v3 = vpop.f32.mrf.mxu0 }
  0xd0   : > { %v445_v4 = vadd.f32 %v444_v2, %v381_v3 }
  0xd6   : > { %v532_v5 = vpop.f32.mrf.mxu2 }
  0xd7   : > { %v537_v6 = vadd.f32 %v532_v5, %v445_v4  ;;  %v383_v7 = vpop.f32.mrf.mxu0  ;;  %v446_v8 = vpop.f32.mrf.mxu1 }
  0xd8   : > { %v447_v9 = vadd.f32 %v446_v8, %v383_v7 }
  0xd9   : > { %539 = vst [vmem:[%s211_s23] sm:$0xff] %v537_v6  ;;  %v549_v12 = vmul.f32 %v537_v6, %v537_v6 }
  0xde   : > { %v534_v10 = vpop.f32.mrf.mxu2 }
  0xdf   : > { %v538_v11 = vadd.f32 %v534_v10, %v447_v9 }
  0xe1   : > { %540 = vst [vmem:[%s211_s23 + $0x8] sm:$0xff] %v538_v11  ;;  %v541_v13 = vadd.f32 %v538_v11, %v537_v6  ;;  %v550_v14 = vmul.f32 %v538_v11, %v538_v11 }
  0xe2   : > { %1013 = shalt.err (!%p1010_p10)
}
  0xe3   : > { %s1095_s20 = smov 128   ;;  %s1096_s25 = smov 8   ;;  %v542_v15 = vrot.slane %v541_v13, 4  ;;  %v551_v16 = vadd.f32 %v550_v14, %v549_v12 }
  0xe4   : > { %864 = dma.vmem_to_hbm [thread:$0]  (%p1184_p7), %s578_s24, 256, %s580_s27, %s560_s28, %s1095_s20, %s1095_s20, %s1096_s25  }
  0xe5   : > { %v543_v17 = vadd.f32 %v542_v15, %v541_v13  ;;  %v552_v18 = vrot.slane %v551_v16, 4  ;;  %s721_s18 = sshll.u32 %s1212_s10, 1  ;;  %s822_s23 = sshll.u32 %s1138_s16, 1 }
  0xe6   : > { %s592_s22 = scalar_lea.hbm %s1299_s3, %s822_s23  ;;  %s218_s29 = scalar_lea.vmem [#allocation9], %s721_s18 }
  0xe7   : > { %v544_v19 = vrot.slane %v543_v17, 2  ;;  %v553_v20 = vadd.f32 %v552_v18, %v551_v16  ;;  %s594_s24 = sshll.u32 %s218_s29, 4  ;;  %s596_s27 = sshll.u32 %s592_s22, 4  ;;  %s595_s24 = int_to_ptr.vmem [resolvable:$true] %s594_s24  ;;  %s597_s27 = int_to_ptr.hbm [resolvable:$true] %s596_s27 }
  0xe8   : > { %s565_s16 = scalar_lea.sflag [#allocation10], %s1212_s10  ;;  %s1028_s28 = sshra.s32 %s597_s27, 4  ;;  %s1029_s28 = int_to_ptr.hbm [resolvable:$true] %s1028_s28 }
  0xe9   : > { %v545_v21 = vadd.f32 %v544_v19, %v543_v17  ;;  %v554_v22 = vrot.slane %v553_v20, 2  ;;  %s1030_s30 = scalar_lea.hbm %s1029_s28, 2  ;;  %s1034_s6 = scalar_lea.hbm %s1299_s3, 4 }
  0xea   : > { %p1031_p12 = scmp.ne.s32.totalorder %s1029_s28, %s1030_s30  ;;  %p1035_p3 = scmp.lt.s32.totalorder %s1029_s28, %s1299_s3 }
  0xeb   : > { %v546_v23 = vrot.slane %v545_v21, 1  ;;  %v555_v24 = vadd.f32 %v554_v22, %v553_v20  ;;  %p1036_p5 = scmp.lt.s32.totalorder %s1034_s6, %s1030_s30 }
  0xec   : > { %p1032_p13 = pnand %p1031_p12, %p1184_p7 }
  0xed   : > { %v547_v25 = vadd.f32 %v546_v23, %v545_v21  ;;  %v556_v26 = vrot.slane %v555_v24, 1  ;;  %p1037_p1 = por %p1036_p5, %p1035_p3 }
  0xee   : > { %p1033_p0 = pneg %p1032_p13 }
  0xef   : > { %548 = vst [vmem:[%s218_s29] sm:$0x1] %v547_v25  ;;  %v557_v27 = vadd.f32 %v556_v26, %v555_v24 }
  0xf0   : > { %p1038_p4 = pnand %p1037_p1, %p1033_p0 }
  0xf1   : > { %558 = vst [vmem:[%s218_s29 + $0x1] sm:$0x1] %v557_v27 }
  0xf2   : > { %1041 = shalt.err (!%p1038_p4)
}
  0xf3   : > { %865 = dma.vmem_to_hbm [thread:$0]  (%p1184_p7), %s595_s24, 32, %s597_s27, %s565_s16  }
  0xf4 PF: > { %s608_s10 = sand.u32 1, %s1076_s12   ;;  %p1309_p8 = scmp.ge.s32.totalorder %s1088_s15, 2 }
  0xf5   : > { %s609_s20 = scalar_lea.sflag [#allocation5], %s608_s10 }
  0xf6   : > { %p877_p11 = pnand %p1309_p8, %p1152_p6 }
  0xf8   : > { %p878_p9 = pneg %p877_p11 }
  0xfa   : > { %1067 = dma.done.wait (%p878_p9), %s609_s20, 256  }
  0xfb   : > { %1069 = vsyncadd (%p878_p9), %s609_s20, 4294967040  ;;  %s619_s25 = scalar_lea.sflag [#allocation10], %s608_s10 }
  0xfc   : > { %1071 = dma.done.wait (%p878_p9), %s619_s25, 32  }
  0xfd   : > { %1073 = vsyncadd (%p878_p9), %s619_s25, 4294967264  ;;  %p21_p7 = scmp.ge.s32.totalorder %s1170_s26, 4   ;;  %s1310_s12 = smov %s1080_s13 }
  0xfe   : > { %s1311_s13 = smov %s1084_s14  ;;  %s1312_s14 = smov %s1180_s4 }
  0xff   : > { %s1313_s15 = smov %s1170_s26  ;;  %23 = sbr.rel (!%p21_p7) target bundleno = 8 (0x8), region = 96 }
 0x104   :  { %625 = vsyncpa [#allocation4], 1 }
 0x105   :  { %627 = vsyncpa [#allocation4 + $0x1], 1 }
 0x106   :  { %628 = vsyncpa [#allocation7], 1 }
 0x107   :  { %629 = vsyncpa [#allocation5], 1 }
 0x108   :  { %631 = vsyncpa [#allocation5 + $0x1], 1 }
 0x109   :  { %632 = vsyncpa [#allocation10], 1 }
 0x10a   :  { %634 = vsyncpa [#allocation10 + $0x1], 1 }

</bundles_post_ra>
